<compile_context>
chip_gen: v6e
topology: v6e:2x2x1
jax: 0.10.0
libtpu: 0.0.40
codegen_flags: <defaults>
</compile_context>

<pallas_src>
import numpy as np

import jax
import jax.numpy as jnp
from jax.experimental import pallas as pl
from jax.experimental.pallas import tpu as pltpu


# ----------------------------------------------------------------------------
# Host-side constant matrices (numpy -> compile-time constants).
# ----------------------------------------------------------------------------
def _adaptive_avg_pool_matrix(in_size: int, out_size: int) -> np.ndarray:
    """[out_size, in_size] matrix M s.t. pooled = M @ x (1-D adaptive avg)."""
    m = np.zeros((out_size, in_size), np.float32)
    for i in range(out_size):
        start = (i * in_size) // out_size
        end = -((-(i + 1) * in_size) // out_size)  # ceil((i+1)*in/out)
        m[i, start:end] = 1.0 / (end - start)
    return m


def _bilinear_upsample_matrix(out_size: int, in_size: int) -> np.ndarray:
    """[out_size, in_size] matrix for 1-D linear interp, align_corners=True."""
    u = np.zeros((out_size, in_size), np.float32)
    if in_size == 1:
        u[:, 0] = 1.0
        return u
    scale = (in_size - 1) / (out_size - 1) if out_size > 1 else 0.0
    for o in range(out_size):
        src = o * scale
        lo = min(int(np.floor(src)), in_size - 1)
        hi = min(lo + 1, in_size - 1)
        frac = src - lo
        u[o, lo] += 1.0 - frac
        u[o, hi] += frac
    return u


# ----------------------------------------------------------------------------
# Pallas kernel.
#   grid = (N, K)   N = batch ("parallel"), K = HW tiles ("arbitrary", reduce)
#   x_ref    : [Cin,  hw_tile]    input tile (batch dim squeezed)
#   at_ref   : [hw_tile, PP]      adaptive-avg-pool matrix tile (transposed)
#   w_ref    : [Cout, Cin]        1x1 conv weight with BN scale folded in
#   bias_ref : [Cout, 1]          folded BN bias (beta - mean*scale)
#   ut_ref   : [PP,   HW_pad]     bilinear (align_corners=True) upsample matrix
#   o_ref    : [Cout, HW_pad]     output block for this batch element
#   acc_ref  : [Cin,  PP] f32     pooled accumulator (VMEM scratch)
# ----------------------------------------------------------------------------
def psp_block_kernel(x_ref, at_ref, w_ref, bias_ref, ut_ref, o_ref, acc_ref):
    k = pl.program_id(1)

    @pl.when(k == 0)
    def _():
        acc_ref[...] = jnp.zeros_like(acc_ref)

    # Adaptive average pool: the real contraction (K = HW) -> MXU, f32 acc.
    acc_ref[...] += jnp.dot(x_ref[...], at_ref[...],
                            preferred_element_type=jnp.float32)   # [Cin, PP]

    @pl.when(k == pl.num_programs(1) - 1)
    def _():
        pooled = acc_ref[...]                                     # [Cin, PP]

        # 1x1 conv (BN scale pre-folded) -> MXU dot (no unrolled FMA chain).
        conv = jnp.dot(w_ref[...], pooled,
                       preferred_element_type=jnp.float32)        # [Cout, PP]

        # Folded BatchNorm bias + ReLU (f32 VPU math, safe on v5e too).
        t = jnp.maximum(conv + bias_ref[...], 0.0)                # [Cout, PP]

        # Bilinear upsample (align_corners=True) -> MXU dot, lane-dense store.
        out = jnp.dot(t, ut_ref[...],
                      preferred_element_type=jnp.float32)         # [Cout, HW_pad]
        o_ref[...] = out.astype(o_ref.dtype)


# ----------------------------------------------------------------------------
# Wrapper
# ----------------------------------------------------------------------------
def psp_block(x, conv_w, bn_scale, bn_bias, pool_size, *,
              hw_tile=None, matmul_dtype=jnp.float32, out_dtype=None):
    """PSPBlock forward.

    x:        [N, Cin, H, W] (NCHW) float32
    conv_w:   [Cout, Cin]   1x1 conv weight
    bn_scale: [Cout]        gamma / sqrt(var + eps)   (1.0 if no BN)
    bn_bias:  [Cout]        beta - mean * scale       (conv bias if no BN)
    Returns   [N, Cout, H, W]

    matmul_dtype: dtype of the pooling-matmul operands (x / pool matrix).
        Use jnp.bfloat16 at real PSPNet sizes to halve x HBM traffic;
        accumulation is always f32.
    """
    N, Cin, H, W = x.shape
    Cout = conv_w.shape[0]
    P = pool_size
    HW, PP = H * W, P * P
    HW_pad = ((HW + 127) // 128) * 128           # lane-dense (128-mult) stores
    out_dtype = out_dtype or x.dtype

    # --- compile-time constant matrices (numpy) ---
    Ah = _adaptive_avg_pool_matrix(H, P)                          # [P, H]
    Aw = _adaptive_avg_pool_matrix(W, P)                          # [P, W]
    At = np.einsum("ph,qw->hwpq", Ah, Aw).reshape(HW, PP)         # [HW, PP]
    At_pad = np.zeros((HW_pad, PP), np.float32)
    At_pad[:HW] = At                                              # pad rows = 0

    Uh = _bilinear_upsample_matrix(H, P)                          # [H, P]
    Uw = _bilinear_upsample_matrix(W, P)                          # [W, P]
    Ut = np.einsum("hp,wq->pqhw", Uh, Uw).reshape(PP, HW)         # [PP, HW]
    Ut_pad = np.zeros((PP, HW_pad), np.float32)
    Ut_pad[:, :HW] = Ut

    # --- fold BN scale into the conv weight (no kron / block-diag) ---
    w_fold = (bn_scale[:, None] * conv_w).astype(jnp.float32)     # [Cout, Cin]
    bias = bn_bias.reshape(Cout, 1).astype(jnp.float32)           # [Cout, 1]

    # --- inputs for the kernel ---
    x_flat = x.reshape(N, Cin, HW)
    if HW_pad != HW:
        x_flat = jnp.pad(x_flat, ((0, 0), (0, 0), (0, HW_pad - HW)))
    x_flat = x_flat.astype(matmul_dtype)
    At_j = jnp.asarray(At_pad, dtype=matmul_dtype)
    Ut_j = jnp.asarray(Ut_pad)                                    # f32

    # --- HW reduction tile: multiple of 128 that divides HW_pad ---
    if hw_tile is None:
        hw_tile = 128
        for cand in range(min(HW_pad, 1024), 0, -128):
            if HW_pad % cand == 0:
                hw_tile = cand
                break
    if HW_pad % hw_tile != 0 or hw_tile % 128 != 0:
        raise ValueError(f"hw_tile={hw_tile} must be a 128-multiple divisor "
                         f"of padded HW={HW_pad}")
    K = HW_pad // hw_tile

    # --- VMEM budget: working set * 2 headroom, clamped to [32, 64] MiB so it
    #     is safe on v7x (64 MiB physical) and still generous on v5e/v6e. ---
    in_bytes = jnp.dtype(matmul_dtype).itemsize
    out_bytes = jnp.dtype(out_dtype).itemsize
    est = (2 * Cin * hw_tile * in_bytes          # x tile, double-buffered
           + 2 * hw_tile * PP * in_bytes         # pool-matrix tile
           + 2 * Cout * HW_pad * out_bytes       # resident output block
           + Cout * Cin * 4 + Cout * 4           # weight + bias
           + PP * HW_pad * 4                     # upsample matrix
           + Cin * PP * 4)                       # accumulator scratch
    vmem_limit = int(max(32 * 1024 * 1024, min(64 * 1024 * 1024, 2 * est)))

    out_flat = pl.pallas_call(
        psp_block_kernel,
        out_shape=jax.ShapeDtypeStruct((N, Cout, HW_pad), out_dtype),
        grid=(N, K),
        in_specs=[
            pl.BlockSpec((None, Cin, hw_tile), lambda b, k: (b, 0, k)),
            pl.BlockSpec((hw_tile, PP), lambda b, k: (k, 0)),
            pl.BlockSpec((Cout, Cin), lambda b, k: (0, 0)),
            pl.BlockSpec((Cout, 1), lambda b, k: (0, 0)),
            pl.BlockSpec((PP, HW_pad), lambda b, k: (0, 0)),
        ],
        out_specs=pl.BlockSpec((None, Cout, HW_pad), lambda b, k: (b, 0, 0)),
        scratch_shapes=[pltpu.VMEM((Cin, PP), jnp.float32)],
        compiler_params=pltpu.CompilerParams(
            dimension_semantics=("parallel", "arbitrary"),
            vmem_limit_bytes=vmem_limit),
    )(x_flat, At_j, w_fold, bias, Ut_j)

    return out_flat[:, :, :HW].reshape(N, Cout, H, W)


# ----------------------------------------------------------------------------
# Pure-JAX reference (same math via standard jnp ops) for sanity check.
# ----------------------------------------------------------------------------
def psp_block_ref(x, conv_w, bn_scale, bn_bias, pool_size):
    N, Cin, H, W = x.shape
    P = pool_size
    Ah = jnp.asarray(_adaptive_avg_pool_matrix(H, P))
    Aw = jnp.asarray(_adaptive_avg_pool_matrix(W, P))
    pooled = jnp.einsum("ph,nchw,qw->ncpq", Ah, x, Aw)
    conv = jnp.einsum("oc,ncpq->nopq", conv_w, pooled)
    act = jnp.maximum(conv * bn_scale[None, :, None, None]
                      + bn_bias[None, :, None, None], 0.0)
    Uh = jnp.asarray(_bilinear_upsample_matrix(H, P))
    Uw = jnp.asarray(_bilinear_upsample_matrix(W, P))
    return jnp.einsum("hp,nopq,wq->nohw", Uh, act, Uw)


if __name__ == "__main__":
    N, Cin, Cout, H, W = 2, 4, 8, 16, 16
    pool_size = 2  # pool_size > 1 -> BatchNorm path (use_bathcnorm=True)

    key = jax.random.PRNGKey(0)
    kx, kw = jax.random.split(key)
    x = jax.random.normal(kx, (N, Cin, H, W), dtype=jnp.float32)

    # Conv2d(Cin, Cout, kernel=1, bias=False because BN is used).
    conv_w = jax.random.normal(kw, (Cout, Cin), dtype=jnp.float32) * 0.1

    # BatchNorm2d folded in inference mode (default-initialized params).
    eps = 1e-5
    gamma = jnp.ones((Cout,), jnp.float32)
    beta = jnp.zeros((Cout,), jnp.float32)
    running_mean = jnp.zeros((Cout,), jnp.float32)
    running_var = jnp.ones((Cout,), jnp.float32)
    bn_scale = gamma / jnp.sqrt(running_var + eps)
    bn_bias = beta - running_mean * bn_scale

    # hw_tile=128 so the demo exercises the multi-step HW reduction pipeline.
    out = psp_block(x, conv_w, bn_scale, bn_bias, pool_size, hw_tile=128)
    out = jax.block_until_ready(out)

    ref = psp_block_ref(x, conv_w, bn_scale, bn_bias, pool_size)
    assert out.shape == (N, Cout, H, W)
    assert jnp.allclose(out, ref, atol=1e-5, rtol=1e-5)

    print("KERNEL_OK")
</pallas_src>

<mosaic_0001>
module attributes {stable_mosaic.version = 11 : i64} {
  func.func @psp_block_kernel(%arg0: i32, %arg1: i32, %arg2: memref<1x4x128xf32, #tpu.memory_space<vmem>>, %arg3: memref<128x4xf32, #tpu.memory_space<vmem>>, %arg4: memref<8x4xf32, #tpu.memory_space<vmem>>, %arg5: memref<8x1xf32, #tpu.memory_space<vmem>>, %arg6: memref<4x256xf32, #tpu.memory_space<vmem>>, %arg7: memref<1x8x256xf32, #tpu.memory_space<vmem>>, %arg8: memref<4x4xf32, #tpu.memory_space<vmem>>) attributes {dimension_semantics = [#tpu.dimension_semantics<parallel>, #tpu.dimension_semantics<arbitrary>], iteration_bounds = array<i64: 2, 2>, scalar_prefetch = 0 : i64, scratch_operands = 1 : i64, tpu.core_type = #tpu.core_type<tc>, window_params = [{transform_indices = @transform_0, window_bounds = array<i64: 1, 4, 128>}, {transform_indices = @transform_1, window_bounds = array<i64: 128, 4>}, {pipeline_mode = #tpu.pipeline_mode<synchronous>, transform_indices = @transform_2, window_bounds = array<i64: 8, 4>}, {pipeline_mode = #tpu.pipeline_mode<synchronous>, transform_indices = @transform_3, window_bounds = array<i64: 8, 1>}, {pipeline_mode = #tpu.pipeline_mode<synchronous>, transform_indices = @transform_4, window_bounds = array<i64: 4, 256>}, {transform_indices = @transform_5, window_bounds = array<i64: 1, 8, 256>}]} {
    %c0_i32 = arith.constant 0 : i32
    %0 = arith.cmpi eq, %arg1, %c0_i32 : i32
    %1 = arith.extui %0 : i1 to i32
    %c0_i32_0 = arith.constant 0 : i32
    %2 = arith.cmpi ne, %1, %c0_i32_0 : i32
    scf.if %2 {
      %cst_10 = arith.constant 0.000000e+00 : f32
      %13 = vector.broadcast %cst_10 : f32 to vector<4x4xf32>
      %c0_11 = arith.constant 0 : index
      %c0_12 = arith.constant 0 : index
      %14 = vector.load %arg8[%c0_11, %c0_12] : memref<4x4xf32, #tpu.memory_space<vmem>>, vector<4x4xf32>
      tpu.vector_store %arg8[%c0_11, %c0_12], %13 {strides = array<i32>} : memref<4x4xf32, #tpu.memory_space<vmem>>, vector<4x4xf32>,
    } else {
    }
    %c0 = arith.constant 0 : index
    %c0_1 = arith.constant 0 : index
    %3 = vector.load %arg8[%c0, %c0_1] : memref<4x4xf32, #tpu.memory_space<vmem>>, vector<4x4xf32>
    %c0_2 = arith.constant 0 : index
    %c0_3 = arith.constant 0 : index
    %c0_4 = arith.constant 0 : index
    %4 = vector.load %arg2[%c0_2, %c0_3, %c0_4] : memref<1x4x128xf32, #tpu.memory_space<vmem>>, vector<1x4x128xf32>
    %5 = vector.shape_cast %4 : vector<1x4x128xf32> to vector<4x128xf32>
    %c0_5 = arith.constant 0 : index
    %c0_6 = arith.constant 0 : index
    %6 = vector.load %arg3[%c0_5, %c0_6] : memref<128x4xf32, #tpu.memory_space<vmem>>, vector<128x4xf32>
    %cst = arith.constant dense<0.000000e+00> : vector<4x4xf32>
    %7 = tpu.matmul %5, %6, %cst {dimension_numbers = #tpu.dot_dimension_numbers<[1], [0], [0], [1], [0, 0, 1, 1], [], []>} : vector<4x128xf32>, vector<128x4xf32>, vector<4x4xf32> -> vector<4x4xf32>
    %8 = arith.addf %3, %7 : vector<4x4xf32>
    %c0_7 = arith.constant 0 : index
    %c0_8 = arith.constant 0 : index
    %9 = vector.load %arg8[%c0_7, %c0_8] : memref<4x4xf32, #tpu.memory_space<vmem>>, vector<4x4xf32>
    tpu.vector_store %arg8[%c0_7, %c0_8], %8 {strides = array<i32>} : memref<4x4xf32, #tpu.memory_space<vmem>>, vector<4x4xf32>,
    %c1_i32 = arith.constant 1 : i32
    %10 = arith.cmpi eq, %arg1, %c1_i32 : i32
    %11 = arith.extui %10 : i1 to i32
    %c0_i32_9 = arith.constant 0 : i32
    %12 = arith.cmpi ne, %11, %c0_i32_9 : i32
    scf.if %12 {
      %c0_10 = arith.constant 0 : index
      %c0_11 = arith.constant 0 : index
      %13 = vector.load %arg8[%c0_10, %c0_11] : memref<4x4xf32, #tpu.memory_space<vmem>>, vector<4x4xf32>
      %c0_12 = arith.constant 0 : index
      %c0_13 = arith.constant 0 : index
      %14 = vector.load %arg4[%c0_12, %c0_13] : memref<8x4xf32, #tpu.memory_space<vmem>>, vector<8x4xf32>
      %cst_14 = arith.constant dense<0.000000e+00> : vector<8x4xf32>
      %15 = tpu.matmul %14, %13, %cst_14 {dimension_numbers = #tpu.dot_dimension_numbers<[1], [0], [0], [1], [0, 0, 1, 1], [], []>} : vector<8x4xf32>, vector<4x4xf32>, vector<8x4xf32> -> vector<8x4xf32>
      %c0_15 = arith.constant 0 : index
      %c0_16 = arith.constant 0 : index
      %16 = vector.load %arg5[%c0_15, %c0_16] : memref<8x1xf32, #tpu.memory_space<vmem>>, vector<8x1xf32>
      %17 = vector.broadcast %16 : vector<8x1xf32> to vector<8x4xf32>
      %18 = arith.addf %15, %17 : vector<8x4xf32>
      %cst_17 = arith.constant 0.000000e+00 : f32
      %19 = vector.broadcast %cst_17 : f32 to vector<8x4xf32>
      %20 = arith.maximumf %18, %19 : vector<8x4xf32>
      %c0_18 = arith.constant 0 : index
      %c0_19 = arith.constant 0 : index
      %21 = vector.load %arg6[%c0_18, %c0_19] : memref<4x256xf32, #tpu.memory_space<vmem>>, vector<4x256xf32>
      %cst_20 = arith.constant dense<0.000000e+00> : vector<8x256xf32>
      %22 = tpu.matmul %20, %21, %cst_20 {dimension_numbers = #tpu.dot_dimension_numbers<[1], [0], [0], [1], [0, 0, 1, 1], [], []>} : vector<8x4xf32>, vector<4x256xf32>, vector<8x256xf32> -> vector<8x256xf32>
      %c0_21 = arith.constant 0 : index
      %c0_22 = arith.constant 0 : index
      %c0_23 = arith.constant 0 : index
      %23 = vector.load %arg7[%c0_21, %c0_22, %c0_23] : memref<1x8x256xf32, #tpu.memory_space<vmem>>, vector<1x8x256xf32>
      %24 = vector.shape_cast %23 : vector<1x8x256xf32> to vector<8x256xf32>
      %25 = vector.shape_cast %22 : vector<8x256xf32> to vector<1x8x256xf32>
      tpu.vector_store %arg7[%c0_21, %c0_22, %c0_23], %25 {strides = array<i32>} : memref<1x8x256xf32, #tpu.memory_space<vmem>>, vector<1x8x256xf32>,
    } else {
    }
    return
  }
  func.func @transform_0(%arg0: i32, %arg1: i32) -> (i32, i32, i32) {
    %c0_i32 = arith.constant 0 : i32
    %c0_i32_0 = arith.constant 0 : i32
    return %arg0, %c0_i32, %arg1 : i32, i32, i32
  }
  func.func @transform_1(%arg0: i32, %arg1: i32) -> (i32, i32) {
    %c0_i32 = arith.constant 0 : i32
    %c0_i32_0 = arith.constant 0 : i32
    return %arg1, %c0_i32 : i32, i32
  }
  func.func @transform_2(%arg0: i32, %arg1: i32) -> (i32, i32) {
    %c0_i32 = arith.constant 0 : i32
    %c0_i32_0 = arith.constant 0 : i32
    %c0_i32_1 = arith.constant 0 : i32
    return %c0_i32, %c0_i32_0 : i32, i32
  }
  func.func @transform_3(%arg0: i32, %arg1: i32) -> (i32, i32) {
    %c0_i32 = arith.constant 0 : i32
    %c0_i32_0 = arith.constant 0 : i32
    %c0_i32_1 = arith.constant 0 : i32
    return %c0_i32, %c0_i32_0 : i32, i32
  }
  func.func @transform_4(%arg0: i32, %arg1: i32) -> (i32, i32) {
    %c0_i32 = arith.constant 0 : i32
    %c0_i32_0 = arith.constant 0 : i32
    %c0_i32_1 = arith.constant 0 : i32
    return %c0_i32, %c0_i32_0 : i32, i32
  }
  func.func @transform_5(%arg0: i32, %arg1: i32) -> (i32, i32, i32) {
    %c0_i32 = arith.constant 0 : i32
    %c0_i32_0 = arith.constant 0 : i32
    %c0_i32_1 = arith.constant 0 : i32
    return %arg0, %c0_i32, %c0_i32_0 : i32, i32, i32
  }
}

</mosaic_0001>

<bundles_post_ra>
// kernel: tpu_custom_call.1
= control target key start
LH: loop header
LB: loop body
LE: loop exit
PB: predicated region body
PF: predicated region fallthrough
CT: control target
= control target key end

     0   :  { %10 = vsyncpa [#allocation4], 0  ;;  %s1105_s0 = inlined_call_operand.vmem [shape: f32[2,4,256], index: 0, kind: input, shape index: {}]   ;;  %s1106_s1 = inlined_call_operand.vmem [shape: f32[256,4], index: 1, kind: input, shape index: {}]   ;;  %s1107_s2 = inlined_call_operand.vmem [shape: f32[8,4], index: 2, kind: input, shape index: {}]   ;;  %s1108_s3 = inlined_call_operand.vmem [shape: f32[8,1], index: 3, kind: input, shape index: {}]   ;;  %s1109_s4 = inlined_call_operand.vmem [shape: f32[4,256], index: 4, kind: input, shape index: {}]   ;;  %s1110_s5 = inlined_call_operand.hbm [shape: f32[2,8,256], index: 5, kind: output, shape index: {}]  }
   0x1   :  { %12 = vsyncpa [#allocation4 + $0x1], 0  ;;  %s934_s18 = smov 0   ;;  %s936_s19 = smov 0  }
   0x2   :  { %s938_s20 = smov 0   ;;  %s940_s21 = smov 0  }
   0x3   :  { %s942_s22 = smov 0   ;;  %s944_s23 = smov 0  }
   0x4   :  { %s946_s24 = smov 0   ;;  %s948_s25 = smov 0  }
   0x5 LB: > { %1114 = sst [smem:[#allocation6_spill]] %s891_s24  ;;  %s642_s26 = sadd.s32 4294967295, %s895_s25   ;;  %s895_s25 = sphi %s948_s25, %s18_s25   ;;  %s891_s24 = sphi %s946_s24, %s1122_s24   ;;  %s887_s23 = sphi %s944_s23, %s1127_s23   ;;  %s883_s22 = sphi %s942_s22, %s1120_s22   ;;  %s879_s21 = sphi %s940_s21, %s1126_s21   ;;  %s875_s20 = sphi %s938_s20, %s1125_s20   ;;  %s871_s19 = sphi %s936_s19, %s1124_s19   ;;  %s867_s18 = sphi %s934_s18, %s1123_s18  }
   0x6   : > { %s643_s27 = sadd.s32 4294967294, %s895_s25   ;;  %s27_s28 = sadd.s32 1, %s887_s23 }
   0x7   : > { %p28_p0 = scmp.ge.s32.totalorder %s27_s28, 2  ;;  %s30_s29 = sadd.s32 1, %s891_s24 }
   0x8   : > { %p164_p1 = scmp.ne.s32.totalorder %s875_s20, %s871_s19  ;;  %p165_p2 = scmp.eq.s32.totalorder %s642_s26, 3 }
   0x9   : > { %s1129_s28 = smov (%p28_p0, %s27_s28), 0  ;;  %s1131_s29 = smov (!%p28_p0, %s30_s29), %s891_s24 }
   0xa   : > { %1115 = sst [smem:[#allocation7_spill]] %s1129_s28  ;;  %p983_p3 = por %p165_p2, %p164_p1 }
   0xb   : > { %p170_p4 = scmp.ne.s32.totalorder %s871_s19, %s867_s18  ;;  %p32_p5 = scmp.ge.s32.totalorder %s1131_s29, 2 }
   0xc   : > { %p171_p6 = scmp.eq.s32.totalorder %s643_s27, 3  ;;  %p646_p7 = scmp.ge.s32.totalorder %s895_s25, 1 }
   0xd   : > { %p218_p8 = scmp.lt.s32.totalorder %s895_s25, 5  ;;  %s1133_s29 = smov (%p32_p5, %s1131_s29), 0 }
   0xe   : > { %1117 = sst [smem:[#allocation8_spill]] %s1133_s29  ;;  %p993_p9 = por %p171_p6, %p170_p4 }
   0xf   : > { %p219_p10 = pnand %p646_p7, %p218_p8  ;;  %s151_s7 = ssub.s32 %s891_s24, %s1133_s29 }
  0x10   : > { %s154_s8 = sadd.s32 1, %s875_s20  ;;  %p152_p11 = scmp.eq.s32.totalorder %s151_s7, 0 }
  0x11   : > { %222 = sbr.rel (%p219_p10) target bundleno = 690 (0x2b2), region = 40  ;;  %s1113_s10 = sand.u32 (!%p219_p10), 1, %s871_s19  }
  0x12   : > { %s1001_s9 = scalar_select %p152_p11, %s875_s20, %s154_s8  }
  0x13   : > { %p254_p12 = scmp.lt.s32.totalorder (!%p219_p10), %s883_s22, 1  ;;  %s647_s11 = sshll.u32 (!%p219_p10), %s1113_s10, 4 }
  0x14   : > { %p256_p13 = scmp.lt.s32.totalorder (!%p219_p10), %s879_s21, 1  ;;  %s650_s12 = sshll.u32 (!%p219_p10), %s879_s21, 4 }
  0x15   : > { %p263_p0 = scmp.lt.s32.totalorder (!%p219_p10), %s650_s12, 31  ;;  %s1021_s10 = scalar_lea.vmem (!%p219_p10), [#allocation3], %s647_s11 }
  0x16   : > { %s255_s13 = scalar_select %p254_p12, %s883_s22, 1 }
  0x17   : > { %s257_s14 = scalar_select %p256_p13, %s879_s21, 1 }
  0x18   : > { %s648_s15 = sshll.u32 %s255_s13, 1  ;;  %s1135_s12 = smov (!%p263_p0, %s650_s12), 31 }
  0x19   : > { %s259_s16 = sadd.s32 %s648_s15, %s257_s14  ;;  %s651_s8 = sshll.u32 %s1135_s12, 3 }
  0x1a   : > { %s649_s17 = sshll.u32 %s259_s16, 2  ;;  %s1019_s24 = scalar_lea.vmem %s1106_s1, %s651_s8 }
  0x1b   : > { %s1014_s7 = scalar_lea.vmem %s1105_s0, %s649_s17  ;;  %p652_p1 = scmp.ne.s32.totalorder %s879_s21, 0 }
  0x1d   : > { %271 = sbr.rel (%p652_p1) target bundleno = 36 (0x24), region = 44 }
  0x22   : > { %vm272_vm0 = vcmask 27648   ;;  %v897_v0 = vmov 0.0  }
  0x23   : > { %273 = vst.msk [vmem:[#allocation2] sm:$0xf] %vm272_vm0, %v897_v0 }
  0x24 PF: > { %v291_v1 = vld [vmem:[%s1019_s24 + $0x78] sm:$0xff]  ;;  %v898_v2 = vmov 0.0   ;;  %v290_v3 = vld [vmem:[%s1019_s24 + $0x70] sm:$0xff]  ;;  %vm899_vm1 = vmmov 0   ;;  %v289_v4 = vld [vmem:[%s1019_s24 + $0x68] sm:$0xff]  ;;  %vm363_vm2 = vcmask 27648  }
  0x25   : > { %684 = vmatprep.subr.mxu0 %v898_v2  ;;  %716 = vmatprep.mubr.msk.f32.mxu0 %vm899_vm1, %v898_v2  ;;  %v288_v5 = vld [vmem:[%s1019_s24 + $0x60] sm:$0xff]  ;;  %v287_v6 = vld [vmem:[%s1019_s24 + $0x58] sm:$0xff]  ;;  %v286_v7 = vld [vmem:[%s1019_s24 + $0x50] sm:$0xff]  ;;  %p653_p2 = scmp.ne.s32.totalorder %s879_s21, 1 }
  0x26   : > { %685 = vmatpush3.msra.mxu0 %v291_v1  ;;  %v285_v8 = vld [vmem:[%s1019_s24 + $0x48] sm:$0xff]  ;;  %v284_v9 = vld [vmem:[%s1019_s24 + $0x40] sm:$0xff]  ;;  %v283_v10 = vld [vmem:[%s1019_s24 + $0x38] sm:$0xff] }
  0x27   : > { %686 = vmatprep.subr.mxu0 %v898_v2  ;;  %v282_v11 = vld [vmem:[%s1019_s24 + $0x30] sm:$0xff]  ;;  %v281_v12 = vld [vmem:[%s1019_s24 + $0x28] sm:$0xff]  ;;  %v280_v13 = vld [vmem:[%s1019_s24 + $0x20] sm:$0xff] }
  0x28   : > { %687 = vmatpush3.msra.mxu0 %v290_v3  ;;  %v279_v14 = vld [vmem:[%s1019_s24 + $0x18] sm:$0xff]  ;;  %v278_v15 = vld [vmem:[%s1019_s24 + $0x10] sm:$0xff]  ;;  %v277_v16 = vld [vmem:[%s1019_s24 + $0x8] sm:$0xff] }
  0x29   : > { %688 = vmatprep.subr.mxu0 %v898_v2  ;;  %v276_v17 = vld [vmem:[%s1019_s24] sm:$0xff] }
  0x2a   : > { %689 = vmatpush3.msra.mxu0 %v289_v4  ;;  %v275_v18 = vld [vmem:[%s1014_s7] sm:$0xf] }
  0x2b   : > { %690 = vmatprep.subr.mxu0 %v898_v2  ;;  %v274_v19 = vld [vmem:[#allocation2] sm:$0xf] }
  0x2c   : > { %691 = vmatpush3.msra.mxu0 %v288_v5 }
  0x2d   : > { %692 = vmatprep.subr.mxu0 %v898_v2 }
  0x2e   : > { %693 = vmatpush3.msra.mxu0 %v287_v6 }
  0x2f   : > { %694 = vmatprep.subr.mxu0 %v898_v2 }
  0x30   : > { %695 = vmatpush3.msra.mxu0 %v286_v7 }
  0x31   : > { %696 = vmatprep.subr.mxu0 %v898_v2 }
  0x32   : > { %697 = vmatpush3.msra.mxu0 %v285_v8 }
  0x33   : > { %698 = vmatprep.subr.mxu0 %v898_v2 }
  0x34   : > { %699 = vmatpush3.msra.mxu0 %v284_v9 }
  0x35   : > { %700 = vmatprep.subr.mxu0 %v898_v2 }
  0x36   : > { %701 = vmatpush3.msra.mxu0 %v283_v10 }
  0x37   : > { %702 = vmatprep.subr.mxu0 %v898_v2 }
  0x38   : > { %703 = vmatpush3.msra.mxu0 %v282_v11 }
  0x39   : > { %704 = vmatprep.subr.mxu0 %v898_v2 }
  0x3a   : > { %705 = vmatpush3.msra.mxu0 %v281_v12 }
  0x3b   : > { %706 = vmatprep.subr.mxu0 %v898_v2 }
  0x3c   : > { %707 = vmatpush3.msra.mxu0 %v280_v13 }
  0x3d   : > { %708 = vmatprep.subr.mxu0 %v898_v2 }
  0x3e   : > { %709 = vmatpush3.msra.mxu0 %v279_v14 }
  0x3f   : > { %710 = vmatprep.subr.mxu0 %v898_v2 }
  0x40   : > { %711 = vmatpush3.msra.mxu0 %v278_v15 }
  0x41   : > { %712 = vmatprep.subr.mxu0 %v898_v2 }
  0x42   : > { %713 = vmatpush3.msra.mxu0 %v277_v16 }
  0x43   : > { %714 = vmatprep.subr.mxu0 %v898_v2 }
  0x44   : > { %715 = vmatpush3.msra.mxu0 %v276_v17 }
  0x45   : > { %717 = vmatmul.mubr.f32.vlgmr.msra.gmra.mxu0 %v275_v18 }
 0x104   : > { %368 = sbr.rel (%p653_p2) target bundleno = 666 (0x29a), region = 48 }
 0x105   : > { %v358_v20 = vpop.f32.mrf.mxu0 }
 0x106   : > { %v362_v21 = vadd.f32 %v358_v20, %v274_v19 }
 0x107   : > { %v718_v22 = vpop.f32.mrf.mxu0 }
 0x108   : > { %364 = vst.msk [vmem:[#allocation2] sm:$0xf] %vm363_vm2, %v362_v21 }
 0x109   : > { %vm381_vm3 = vcmask 1043456   ;;  %v370_v24 = vld [vmem:[%s1107_s2] sm:$0xff]  ;;  %v900_v25 = vmov 0.0   ;;  %vm901_vm4 = vmmov 0   ;;  %vm377_vm5 = vcmask 31744  }
 0x10a   : > { %719 = vmatprep.subr.mxu0 %v900_v25  ;;  %721 = vmatprep.mubr.msk.f32.mxu0 %vm901_vm4, %v900_v25  ;;  %v371_v26 = vld [vmem:[%s1108_s3] sm:$0xff]  ;;  %v902_v27 = vmov 0  }
 0x10b   : > { %801 = vset.pattern.permute.xlu0 %v902_v27  ;;  %530 = vmatprep.mubr.f32.mxu1 %v900_v25  ;;  %v456_v28 = vld [vmem:[%s1109_s4] sm:$0xff] }
 0x10c   : > { %374 = vperm.xlu0 %801, %v371_v26   ;;  %v458_v29 = vcombine.high %v456_v28, %v456_v28 }
 0x10e   : > { %656 = vmatprep.subr.msk.mxu1 %vm381_vm3, %v458_v29 }
 0x10f   : > { %v369_v23 = vld [vmem:[#allocation2] sm:$0xf]  ;;  %657 = vmatpush1.msk.msra.mxu1 %vm381_vm3, %v456_v28 }
 0x110   : > { %720 = vmatpush3.msk.msra.mxu0 %vm381_vm3, %v369_v23 }
 0x111   : > { %722 = vmatmul.mubr.msk.f32.vlgmr.msra.gmra.mxu0 %vm377_vm5, %v370_v24 }
 0x187   : > { %v375_v30 = vpop.permute.xlu0 %374 }
 0x1d1   : > { %v451_v31 = vpop.f32.mrf.mxu0 }
 0x1d2   : > { %v452_v32 = vadd.f32 %v451_v31, %v375_v30 }
 0x1d3   : > { %v723_v33 = vpop.f32.mrf.mxu0 }
 0x1d4   : > { %v455_v34 = vmax.f32 %v452_v32, 0.0 }
 0x1d6   : > { %658 = vmatmul.mubr.msk.f32.vlgmr.msra.gmra.mxu1 %vm377_vm5, %v455_v34 }
 0x296   : > { %v532_v35 = vpop.f32.mrf.mxu1 }
 0x297   : > { %537 = vst [vmem:[%s1021_s10] sm:$0xff] %v532_v35 }
 0x298   : > { %v534_v36 = vpop.f32.mrf.mxu1 }
 0x299   : > { %538 = vst [vmem:[%s1021_s10 + $0x8] sm:$0xff] %v534_v36 }
 0x29a PF: > { %s664_s13 = sshll.u32 %s883_s22, 8  ;;  %s554_s17 = sshll.u32 %s1021_s10, 4  ;;  %s555_s17 = int_to_ptr.vmem [resolvable:$true] %s554_s17 }
 0x29b   : > { %s552_s16 = scalar_lea.hbm %s1110_s5, %s664_s13  ;;  %s1119_s26 = sand.u32 1, %s871_s19  }
 0x29c   : > { %s540_s27 = scalar_lea.sflag [#allocation4], %s1119_s26  ;;  %s803_s7 = scalar_lea.vmem %s555_s17, 256 }
 0x29d   : > { %p804_p4 = scmp.ne.s32.totalorder %s555_s17, %s803_s7  ;;  %s903_s8 = smov [#allocation3]  }
 0x29e   : > { %s807_s28 = sshll.u32 %s903_s8, 4  ;;  %s808_s28 = int_to_ptr.vmem [resolvable:$false] %s807_s28 }
 0x29f   : > { %p805_p5 = pnand %p804_p4, %p983_p3  ;;  %s809_s29 = scalar_lea.vmem %s808_s28, 512 }
 0x2a0   : > { %p810_p7 = scmp.lt.s32.totalorder %s555_s17, %s808_s28  ;;  %p811_p8 = scmp.lt.s32.totalorder %s809_s29, %s803_s7 }
 0x2a1   : > { %p806_p6 = pneg %p805_p5 }
 0x2a2   : > { %p812_p10 = por %p811_p8, %p810_p7 }
 0x2a4   : > { %p813_p11 = pnand %p812_p10, %p806_p6 }
 0x2a6   : > { %816 = shalt.err (!%p813_p11)
}
 0x2a7   : > { %s817_s22 = scalar_lea.hbm %s552_s16, 256  ;;  %s821_s11 = scalar_lea.hbm %s1110_s5, 512 }
 0x2a8   : > { %p818_p12 = scmp.ne.s32.totalorder %s552_s16, %s817_s22  ;;  %p822_p1 = scmp.lt.s32.totalorder %s552_s16, %s1110_s5 }
 0x2a9   : > { %p823_p2 = scmp.lt.s32.totalorder %s821_s11, %s817_s22 }
 0x2aa   : > { %p819_p13 = pnand %p818_p12, %p983_p3 }
 0x2ab   : > { %p824_p4 = por %p823_p2, %p822_p1 }
 0x2ac   : > { %p820_p0 = pneg %p819_p13 }
 0x2ae   : > { %p825_p5 = pnand %p824_p4, %p820_p0 }
 0x2b0   : > { %828 = shalt.err (!%p825_p5)
}
 0x2b1   : > { %724 = dma.vmem_to_hbm [thread:$0]  (%p983_p3), %s555_s17, 256, %s552_s16, %s540_s27  }
 0x2b2 PF: > { %p730_p6 = scmp.ge.s32.totalorder %s895_s25, 2  ;;  %s566_s13 = sand.u32 1, %s867_s18  }
 0x2b3   : > { %s567_s14 = scalar_lea.sflag [#allocation4], %s566_s13 }
 0x2b4   : > { %p727_p7 = pnand %p730_p6, %p993_p9 }
 0x2b6   : > { %p728_p8 = pneg %p727_p7 }
 0x2b8   : > { %862 = dma.done.wait (%p728_p8), %s567_s14, 256  }
 0x2b9   : > { %864 = vsyncadd (%p728_p8), %s567_s14, 4294967040  ;;  %s18_s25 = sadd.s32 1, %s895_s25   ;;  %s1120_s22 = sld [smem:[#allocation6_spill]] }
 0x2ba   : > { %p15_p10 = scmp.ge.s32.totalorder %s18_s25, 6   ;;  %s1121_s30 = sld [smem:[#allocation7_spill]] }
 0x2bb   : > { %s1122_s24 = sld [smem:[#allocation8_spill]]  ;;  %s1123_s18 = smov %s871_s19 }
 0x2bc   : > { %s1124_s19 = smov %s875_s20  ;;  %s1125_s20 = smov %s1001_s9 }
 0x2bd   : > { %s1126_s21 = smov %s887_s23  ;;  %17 = sbr.rel (!%p15_p10) target bundleno = 5 (0x5), region = 86 }
 0x2c0   : > { %s1127_s23 = smov %s1121_s30 }
 0x2c2   :  { %572 = vsyncpa [#allocation4], 1 }
 0x2c3   :  { %574 = vsyncpa [#allocation4 + $0x1], 1 }

</bundles_post_ra>
